<compile_context>
chip_gen: v5e
topology: v5e:2x2
jax: 0.10.0
libtpu: 0.0.40
codegen_flags: <defaults>
</compile_context>

<pallas_src>
import jax
import jax.numpy as jnp
from jax import lax
from jax.experimental import pallas as pl
from jax.experimental.pallas import tpu as pltpu
import numpy as np


def _bilinear_matrix(in_size, out_size):
    """align_corners=True bilinear interpolation matrix of shape (out_size, in_size)."""
    y = jnp.arange(out_size, dtype=jnp.float32)
    src = y * (in_size - 1) / (out_size - 1) if out_size > 1 else jnp.zeros((1,), jnp.float32)
    i0 = jnp.clip(jnp.floor(src).astype(jnp.int32), 0, in_size - 1)
    i1 = jnp.minimum(i0 + 1, in_size - 1)
    frac = src - i0.astype(jnp.float32)
    cols = jnp.arange(in_size)
    m = ((cols[None, :] == i0[:, None]).astype(jnp.float32) * (1.0 - frac)[:, None]
         + (cols[None, :] == i1[:, None]).astype(jnp.float32) * frac[:, None])
    return m


def fused_up_block(x1f, x2f, w1T, b1, UkT, wAf, sA, tA, wBf, sB, tB, masks, Wo):
    """Single fused kernel for the whole _UpBlock forward (inference semantics).

    x1f: (N, C1, H*W); x2f: (N, C2, Ho*Wo); w1T: (C2, C1); b1: (C2, 1);
    UkT: (H*W, Ho*Wo) flat bilinear operator; wAf: (OC, 9*2*C2); wBf: (OC, 9*OC);
    s*/t*: (OC, 1) folded BN; masks: (2, Ho*Wo) left/right column-validity masks.
    Returns (N, OC, Ho*Wo) (NCHW with flattened spatial, lane-dense).
    """
    N, C1, HW = x1f.shape
    _, C2, HoWo = x2f.shape
    CinA = 2 * C2
    OC = wAf.shape[0]
    pad = Wo + 1                 # halo margin in flattened-spatial (lane) coordinates
    P = HoWo + 2 * pad           # padded flat length

    def conv3x3(p_ref, w_ref, s_ref, t_ref, mlv, mrv, Cin):
        # im2col on the zero-bordered flat buffer: tap (ky,kx) == static lane shift by
        # (ky-1)*Wo + (kx-1); ml/mr masks kill the row-wrap columns.  Split into 3
        # accumulating matmuls (K = 3*Cin, one per ky) to limit live vregs.
        acc = None
        for ky in range(3):
            pieces = []
            for kx in range(3):
                start = pad + (ky - 1) * Wo + (kx - 1)
                piece = p_ref[:, start:start + HoWo]              # (Cin, HoWo)
                if kx == 0:
                    piece = piece * mlv
                elif kx == 2:
                    piece = piece * mrv
                pieces.append(piece)
            cols = jnp.concatenate(pieces, axis=0)                # (3*Cin, HoWo)
            wk = w_ref[:, ky * 3 * Cin:(ky + 1) * 3 * Cin]        # (OC, 3*Cin)
            part = jnp.dot(wk, cols, preferred_element_type=jnp.float32)
            acc = part if acc is None else acc + part
        z = acc * s_ref[...] + t_ref[...]                         # folded eval-mode BN (+conv bias)
        return jnp.where(z > 0, z, 0.01 * z)                      # LeakyReLU(0.01)

    def kernel(x1_ref, x2_ref, w1T_ref, b1_ref, uk_ref, wA_ref, sA_ref, tA_ref,
               wB_ref, sB_ref, tB_ref, m_ref, o_ref, pA, pB):
        mlv = m_ref[0:1, :]                                       # (1, HoWo)
        mrv = m_ref[1:2, :]
        # Halo borders re-zeroed every grid step (cheap; interior writes never touch them).
        pA[:, 0:pad] = jnp.zeros((CinA, pad), jnp.float32)
        pA[:, pad + HoWo:P] = jnp.zeros((CinA, pad), jnp.float32)
        pB[:, 0:pad] = jnp.zeros((OC, pad), jnp.float32)
        pB[:, pad + HoWo:P] = jnp.zeros((OC, pad), jnp.float32)

        # 1x1 conv as a single MXU matmul on the flat input.
        y = jnp.dot(w1T_ref[...], x1_ref[0].astype(jnp.float32),
                    preferred_element_type=jnp.float32)           # (C2, H*W)
        # 2x bilinear upsample (align_corners=True) as one lane-dense matmul; bias added
        # after (exact: bilinear weights sum to 1).
        up = jnp.dot(y, uk_ref[...],
                     preferred_element_type=jnp.float32) + b1_ref[...]   # (C2, HoWo)

        # torch.cat([x2, up], dim=1) written straight into the padded scratch.
        pA[0:C2, pad:pad + HoWo] = x2_ref[0].astype(jnp.float32)
        pA[C2:CinA, pad:pad + HoWo] = up

        h = conv3x3(pA, wA_ref, sA_ref, tA_ref, mlv, mrv, CinA)   # (OC, HoWo), VMEM only
        # TODO(synk): nn.Dropout between the convs is identity here (inference semantics).
        pB[:, pad:pad + HoWo] = h
        o = conv3x3(pB, wB_ref, sB_ref, tB_ref, mlv, mrv, OC)     # (OC, HoWo)
        o_ref[0] = o.astype(o_ref.dtype)                          # lane-dense store

    return pl.pallas_call(
        kernel,
        out_shape=jax.ShapeDtypeStruct((N, OC, HoWo), x2f.dtype),
        grid=(N,),
        in_specs=[
            pl.BlockSpec((1, C1, HW), lambda n: (n, 0, 0)),
            pl.BlockSpec((1, C2, HoWo), lambda n: (n, 0, 0)),
            pl.BlockSpec((C2, C1), lambda n: (0, 0)),
            pl.BlockSpec((C2, 1), lambda n: (0, 0)),
            pl.BlockSpec((HW, HoWo), lambda n: (0, 0)),
            pl.BlockSpec((OC, 9 * CinA), lambda n: (0, 0)),
            pl.BlockSpec((OC, 1), lambda n: (0, 0)),
            pl.BlockSpec((OC, 1), lambda n: (0, 0)),
            pl.BlockSpec((OC, 9 * OC), lambda n: (0, 0)),
            pl.BlockSpec((OC, 1), lambda n: (0, 0)),
            pl.BlockSpec((OC, 1), lambda n: (0, 0)),
            pl.BlockSpec((2, HoWo), lambda n: (0, 0)),
        ],
        out_specs=pl.BlockSpec((1, OC, HoWo), lambda n: (n, 0, 0)),
        scratch_shapes=[pltpu.VMEM((CinA, P), jnp.float32),
                        pltpu.VMEM((OC, P), jnp.float32)],
        compiler_params=pltpu.CompilerParams(
            dimension_semantics=("parallel",),      # batch shards across v7x TensorCores
            vmem_limit_bytes=32 * 1024 * 1024),
    )(x1f, x2f, w1T, b1, UkT, wAf, sA, tA, wBf, sB, tB, masks)


def init_up_block_params(key, in_ch1, in_ch2, out_ch):
    """Deterministic synthetic parameters (Conv2d weights/biases, eval-mode BatchNorm affine)."""
    ks = jax.random.split(key, 10)
    eps = 1e-5
    p = {}
    p["w1x1"] = jax.random.normal(ks[0], (in_ch1, in_ch2), jnp.float32) * 0.1
    p["b1x1"] = jax.random.normal(ks[1], (in_ch2,), jnp.float32) * 0.1

    def conv_bn(kw, kb, kg, kbeta, cin, cout):
        w = jax.random.normal(kw, (3, 3, cin, cout), jnp.float32) * 0.1   # HWIO
        b = jax.random.normal(kb, (cout,), jnp.float32) * 0.1
        gamma = 1.0 + 0.1 * jax.random.normal(kg, (cout,), jnp.float32)
        beta = 0.1 * jax.random.normal(kbeta, (cout,), jnp.float32)
        run_mean = jnp.zeros((cout,), jnp.float32)
        run_var = jnp.ones((cout,), jnp.float32)
        scale = gamma / jnp.sqrt(run_var + eps)
        shift = beta + (b - run_mean) * scale
        return w, scale, shift

    p["wA"], p["sA"], p["tA"] = conv_bn(ks[2], ks[3], ks[4], ks[5], 2 * in_ch2, out_ch)
    p["wB"], p["sB"], p["tB"] = conv_bn(ks[6], ks[7], ks[8], ks[9], out_ch, out_ch)
    return p


def up_block_forward(x1_nchw, x2_nchw, params):
    # TODO(synk): train-mode BatchNorm (batch statistics) and Dropout random masking are not
    # implemented; inference-mode semantics are used (BN folded into scale/shift, Dropout = id).
    N, C1, H, W = x1_nchw.shape
    _, C2, Ho, Wo = x2_nchw.shape
    OC = params["sA"].shape[0]
    CinA = 2 * C2

    # flat 2x bilinear (align_corners=True) operator: up_flat = y_flat @ kron(uh, uw)^T
    UkT = jnp.kron(_bilinear_matrix(H, Ho), _bilinear_matrix(W, Wo)).T   # (H*W, Ho*Wo)
    w1T = params["w1x1"].T                                               # (C2, C1)
    b1 = params["b1x1"].reshape(C2, 1)

    # free reshapes: channels-first, spatial dims flattened onto the lane axis
    x1f = x1_nchw.reshape(N, C1, H * W)
    x2f = x2_nchw.reshape(N, C2, Ho * Wo)
    # conv weights reordered to (Cout, (ky,kx)-tap-major, cin) to match the in-kernel im2col rows
    wAf = jnp.transpose(params["wA"], (3, 0, 1, 2)).reshape(OC, 9 * CinA)
    wBf = jnp.transpose(params["wB"], (3, 0, 1, 2)).reshape(OC, 9 * OC)
    sA = params["sA"].reshape(OC, 1)
    tA = params["tA"].reshape(OC, 1)
    sB = params["sB"].reshape(OC, 1)
    tB = params["tB"].reshape(OC, 1)
    # left/right column-validity masks for the flattened-lane 3x3 taps.  Kept as a tiny (2 KB)
    # input rather than built in-kernel to avoid relying on vector int-mod / reshape lowering.
    xs = jnp.arange(Ho * Wo, dtype=jnp.int32) % Wo
    masks = jnp.stack([(xs != 0).astype(jnp.float32),
                       (xs != Wo - 1).astype(jnp.float32)], axis=0)      # (2, Ho*Wo)

    of = fused_up_block(x1f, x2f, w1T, b1, UkT, wAf, sA, tA, wBf, sB, tB, masks, Wo)
    return of.reshape(N, OC, Ho, Wo)                                     # free reshape to NCHW


def up_block_reference(x1_nchw, x2_nchw, params):
    """Pure-JAX reference for correctness checking."""
    x1 = jnp.transpose(x1_nchw, (0, 2, 3, 1))
    x2 = jnp.transpose(x2_nchw, (0, 2, 3, 1))
    _, H, W, _ = x1.shape
    uh = _bilinear_matrix(H, 2 * H)
    uw = _bilinear_matrix(W, 2 * W)
    y = jnp.einsum('nhwc,cd->nhwd', x1, params["w1x1"]) + params["b1x1"]
    up = jnp.einsum('Yh,nhwc->nYwc', uh, y)
    up = jnp.einsum('Xw,nYwc->nYXc', uw, up)
    x = jnp.concatenate([x2, up], axis=-1)

    def conv_bn(z, w, s, t):
        z = lax.conv_general_dilated(z, w, (1, 1), 'SAME',
                                     dimension_numbers=('NHWC', 'HWIO', 'NHWC'))
        z = z * s + t
        return jnp.where(z > 0, z, 0.01 * z)

    h = conv_bn(x, params["wA"], params["sA"], params["tA"])
    out = conv_bn(h, params["wB"], params["sB"], params["tB"])
    return jnp.transpose(out, (0, 3, 1, 2))


if __name__ == "__main__":
    key = jax.random.PRNGKey(0)
    k1, k2, kp = jax.random.split(key, 3)
    N, C1, C2, OC, H, W = 2, 8, 4, 8, 8, 8       # in_channels1=8, in_channels2=4, out_channels=8
    x1 = jax.random.normal(k1, (N, C1, H, W), jnp.float32)          # NCHW
    x2 = jax.random.normal(k2, (N, C2, 2 * H, 2 * W), jnp.float32)  # NCHW skip connection
    params = init_up_block_params(kp, C1, C2, OC)

    out = jax.block_until_ready(up_block_forward(x1, x2, params))
    ref = jax.block_until_ready(up_block_reference(x1, x2, params))
    assert out.shape == (N, OC, 2 * H, 2 * W), out.shape
    np.testing.assert_allclose(np.asarray(out), np.asarray(ref), rtol=2e-2, atol=2e-2)
    print("KERNEL_OK")
</pallas_src>

<mosaic_0001>
module attributes {stable_mosaic.version = 11 : i64} {
  func.func @kernel(%arg0: i32, %arg1: memref<1x8x64xf32, #tpu.memory_space<vmem>>, %arg2: memref<1x4x256xf32, #tpu.memory_space<vmem>>, %arg3: memref<4x8xf32, #tpu.memory_space<vmem>>, %arg4: memref<4x1xf32, #tpu.memory_space<vmem>>, %arg5: memref<64x256xf32, #tpu.memory_space<vmem>>, %arg6: memref<8x72xf32, #tpu.memory_space<vmem>>, %arg7: memref<8x1xf32, #tpu.memory_space<vmem>>, %arg8: memref<8x1xf32, #tpu.memory_space<vmem>>, %arg9: memref<8x72xf32, #tpu.memory_space<vmem>>, %arg10: memref<8x1xf32, #tpu.memory_space<vmem>>, %arg11: memref<8x1xf32, #tpu.memory_space<vmem>>, %arg12: memref<2x256xf32, #tpu.memory_space<vmem>>, %arg13: memref<1x8x256xf32, #tpu.memory_space<vmem>>, %arg14: memref<8x290xf32, #tpu.memory_space<vmem>>, %arg15: memref<8x290xf32, #tpu.memory_space<vmem>>) attributes {dimension_semantics = [#tpu.dimension_semantics<parallel>], iteration_bounds = array<i64: 2>, scalar_prefetch = 0 : i64, scratch_operands = 2 : i64, tpu.core_type = #tpu.core_type<tc>, window_params = [{transform_indices = @transform_0, window_bounds = array<i64: 1, 8, 64>}, {transform_indices = @transform_1, window_bounds = array<i64: 1, 4, 256>}, {pipeline_mode = #tpu.pipeline_mode<synchronous>, transform_indices = @transform_2, window_bounds = array<i64: 4, 8>}, {pipeline_mode = #tpu.pipeline_mode<synchronous>, transform_indices = @transform_3, window_bounds = array<i64: 4, 1>}, {pipeline_mode = #tpu.pipeline_mode<synchronous>, transform_indices = @transform_4, window_bounds = array<i64: 64, 256>}, {pipeline_mode = #tpu.pipeline_mode<synchronous>, transform_indices = @transform_5, window_bounds = array<i64: 8, 72>}, {pipeline_mode = #tpu.pipeline_mode<synchronous>, transform_indices = @transform_6, window_bounds = array<i64: 8, 1>}, {pipeline_mode = #tpu.pipeline_mode<synchronous>, transform_indices = @transform_7, window_bounds = array<i64: 8, 1>}, {pipeline_mode = #tpu.pipeline_mode<synchronous>, transform_indices = @transform_8, window_bounds = array<i64: 8, 72>}, {pipeline_mode = #tpu.pipeline_mode<synchronous>, transform_indices = @transform_9, window_bounds = array<i64: 8, 1>}, {pipeline_mode = #tpu.pipeline_mode<synchronous>, transform_indices = @transform_10, window_bounds = array<i64: 8, 1>}, {pipeline_mode = #tpu.pipeline_mode<synchronous>, transform_indices = @transform_11, window_bounds = array<i64: 2, 256>}, {transform_indices = @transform_12, window_bounds = array<i64: 1, 8, 256>}]} {
    %c0 = arith.constant 0 : index
    %c0_0 = arith.constant 0 : index
    %0 = vector.load %arg12[%c0, %c0_0] : memref<2x256xf32, #tpu.memory_space<vmem>>, vector<1x256xf32>
    %c1 = arith.constant 1 : index
    %c0_1 = arith.constant 0 : index
    %1 = vector.load %arg12[%c1, %c0_1] : memref<2x256xf32, #tpu.memory_space<vmem>>, vector<1x256xf32>
    %cst = arith.constant 0.000000e+00 : f32
    %2 = vector.broadcast %cst : f32 to vector<8x17xf32>
    %c0_2 = arith.constant 0 : index
    %c0_3 = arith.constant 0 : index
    %3 = vector.load %arg14[%c0_2, %c0_3] : memref<8x290xf32, #tpu.memory_space<vmem>>, vector<8x17xf32>
    tpu.vector_store %arg14[%c0_2, %c0_3], %2 {strides = array<i32>} : memref<8x290xf32, #tpu.memory_space<vmem>>, vector<8x17xf32>,
    %cst_4 = arith.constant 0.000000e+00 : f32
    %4 = vector.broadcast %cst_4 : f32 to vector<8x17xf32>
    %c0_5 = arith.constant 0 : index
    %c273 = arith.constant 273 : index
    %5 = vector.load %arg14[%c0_5, %c273] : memref<8x290xf32, #tpu.memory_space<vmem>>, vector<8x17xf32>
    tpu.vector_store %arg14[%c0_5, %c273], %4 {strides = array<i32>} : memref<8x290xf32, #tpu.memory_space<vmem>>, vector<8x17xf32>,
    %cst_6 = arith.constant 0.000000e+00 : f32
    %6 = vector.broadcast %cst_6 : f32 to vector<8x17xf32>
    %c0_7 = arith.constant 0 : index
    %c0_8 = arith.constant 0 : index
    %7 = vector.load %arg15[%c0_7, %c0_8] : memref<8x290xf32, #tpu.memory_space<vmem>>, vector<8x17xf32>
    tpu.vector_store %arg15[%c0_7, %c0_8], %6 {strides = array<i32>} : memref<8x290xf32, #tpu.memory_space<vmem>>, vector<8x17xf32>,
    %cst_9 = arith.constant 0.000000e+00 : f32
    %8 = vector.broadcast %cst_9 : f32 to vector<8x17xf32>
    %c0_10 = arith.constant 0 : index
    %c273_11 = arith.constant 273 : index
    %9 = vector.load %arg15[%c0_10, %c273_11] : memref<8x290xf32, #tpu.memory_space<vmem>>, vector<8x17xf32>
    tpu.vector_store %arg15[%c0_10, %c273_11], %8 {strides = array<i32>} : memref<8x290xf32, #tpu.memory_space<vmem>>, vector<8x17xf32>,
    %c0_12 = arith.constant 0 : index
    %c0_13 = arith.constant 0 : index
    %10 = vector.load %arg3[%c0_12, %c0_13] : memref<4x8xf32, #tpu.memory_space<vmem>>, vector<4x8xf32>
    %c0_14 = arith.constant 0 : index
    %c0_15 = arith.constant 0 : index
    %c0_16 = arith.constant 0 : index
    %11 = vector.load %arg1[%c0_14, %c0_15, %c0_16] : memref<1x8x64xf32, #tpu.memory_space<vmem>>, vector<1x8x64xf32>
    %12 = vector.shape_cast %11 : vector<1x8x64xf32> to vector<8x64xf32>
    %cst_17 = arith.constant dense<0.000000e+00> : vector<4x64xf32>
    %13 = tpu.matmul %10, %12, %cst_17 {dimension_numbers = #tpu.dot_dimension_numbers<[1], [0], [0], [1], [0, 0, 1, 1], [], []>} : vector<4x8xf32>, vector<8x64xf32>, vector<4x64xf32> -> vector<4x64xf32>
    %c0_18 = arith.constant 0 : index
    %c0_19 = arith.constant 0 : index
    %14 = vector.load %arg5[%c0_18, %c0_19] : memref<64x256xf32, #tpu.memory_space<vmem>>, vector<64x256xf32>
    %cst_20 = arith.constant dense<0.000000e+00> : vector<4x256xf32>
    %15 = tpu.matmul %13, %14, %cst_20 {dimension_numbers = #tpu.dot_dimension_numbers<[1], [0], [0], [1], [0, 0, 1, 1], [], []>} : vector<4x64xf32>, vector<64x256xf32>, vector<4x256xf32> -> vector<4x256xf32>
    %c0_21 = arith.constant 0 : index
    %c0_22 = arith.constant 0 : index
    %16 = vector.load %arg4[%c0_21, %c0_22] : memref<4x1xf32, #tpu.memory_space<vmem>>, vector<4x1xf32>
    %17 = vector.broadcast %16 : vector<4x1xf32> to vector<4x256xf32>
    %18 = arith.addf %15, %17 : vector<4x256xf32>
    %c0_23 = arith.constant 0 : index
    %c0_24 = arith.constant 0 : index
    %c0_25 = arith.constant 0 : index
    %19 = vector.load %arg2[%c0_23, %c0_24, %c0_25] : memref<1x4x256xf32, #tpu.memory_space<vmem>>, vector<1x4x256xf32>
    %20 = vector.shape_cast %19 : vector<1x4x256xf32> to vector<4x256xf32>
    %c0_26 = arith.constant 0 : index
    %c17 = arith.constant 17 : index
    %21 = vector.load %arg14[%c0_26, %c17] : memref<8x290xf32, #tpu.memory_space<vmem>>, vector<4x256xf32>
    tpu.vector_store %arg14[%c0_26, %c17], %20 {strides = array<i32>} : memref<8x290xf32, #tpu.memory_space<vmem>>, vector<4x256xf32>,
    %c4 = arith.constant 4 : index
    %c17_27 = arith.constant 17 : index
    %22 = vector.load %arg14[%c4, %c17_27] : memref<8x290xf32, #tpu.memory_space<vmem>>, vector<4x256xf32>
    tpu.vector_store %arg14[%c4, %c17_27], %18 {strides = array<i32>} : memref<8x290xf32, #tpu.memory_space<vmem>>, vector<4x256xf32>,
    %c0_28 = arith.constant 0 : index
    %c0_29 = arith.constant 0 : index
    %23 = vector.load %arg14[%c0_28, %c0_29] : memref<8x290xf32, #tpu.memory_space<vmem>>, vector<8x256xf32>
    %24 = vector.broadcast %0 : vector<1x256xf32> to vector<8x256xf32>
    %25 = arith.mulf %23, %24 : vector<8x256xf32>
    %c0_30 = arith.constant 0 : index
    %c1_31 = arith.constant 1 : index
    %26 = vector.load %arg14[%c0_30, %c1_31] : memref<8x290xf32, #tpu.memory_space<vmem>>, vector<8x256xf32>
    %c0_32 = arith.constant 0 : index
    %c2 = arith.constant 2 : index
    %27 = vector.load %arg14[%c0_32, %c2] : memref<8x290xf32, #tpu.memory_space<vmem>>, vector<8x256xf32>
    %28 = vector.broadcast %1 : vector<1x256xf32> to vector<8x256xf32>
    %29 = arith.mulf %27, %28 : vector<8x256xf32>
    %30 = tpu.concatenate %25, %26, %29 in 0 : vector<8x256xf32>, vector<8x256xf32>, vector<8x256xf32> -> vector<24x256xf32>
    %c0_33 = arith.constant 0 : index
    %c0_34 = arith.constant 0 : index
    %31 = vector.load %arg6[%c0_33, %c0_34] : memref<8x72xf32, #tpu.memory_space<vmem>>, vector<8x24xf32>
    %cst_35 = arith.constant dense<0.000000e+00> : vector<8x256xf32>
    %32 = tpu.matmul %31, %30, %cst_35 {dimension_numbers = #tpu.dot_dimension_numbers<[1], [0], [0], [1], [0, 0, 1, 1], [], []>} : vector<8x24xf32>, vector<24x256xf32>, vector<8x256xf32> -> vector<8x256xf32>
    %c0_36 = arith.constant 0 : index
    %c16 = arith.constant 16 : index
    %33 = vector.load %arg14[%c0_36, %c16] : memref<8x290xf32, #tpu.memory_space<vmem>>, vector<8x256xf32>
    %34 = vector.broadcast %0 : vector<1x256xf32> to vector<8x256xf32>
    %35 = arith.mulf %33, %34 : vector<8x256xf32>
    %c0_37 = arith.constant 0 : index
    %c17_38 = arith.constant 17 : index
    %36 = vector.load %arg14[%c0_37, %c17_38] : memref<8x290xf32, #tpu.memory_space<vmem>>, vector<8x256xf32>
    %c0_39 = arith.constant 0 : index
    %c18 = arith.constant 18 : index
    %37 = vector.load %arg14[%c0_39, %c18] : memref<8x290xf32, #tpu.memory_space<vmem>>, vector<8x256xf32>
    %38 = vector.broadcast %1 : vector<1x256xf32> to vector<8x256xf32>
    %39 = arith.mulf %37, %38 : vector<8x256xf32>
    %40 = tpu.concatenate %35, %36, %39 in 0 : vector<8x256xf32>, vector<8x256xf32>, vector<8x256xf32> -> vector<24x256xf32>
    %c0_40 = arith.constant 0 : index
    %c24 = arith.constant 24 : index
    %41 = vector.load %arg6[%c0_40, %c24] : memref<8x72xf32, #tpu.memory_space<vmem>>, vector<8x24xf32>
    %cst_41 = arith.constant dense<0.000000e+00> : vector<8x256xf32>
    %42 = tpu.matmul %41, %40, %cst_41 {dimension_numbers = #tpu.dot_dimension_numbers<[1], [0], [0], [1], [0, 0, 1, 1], [], []>} : vector<8x24xf32>, vector<24x256xf32>, vector<8x256xf32> -> vector<8x256xf32>
    %43 = arith.addf %32, %42 : vector<8x256xf32>
    %c0_42 = arith.constant 0 : index
    %c32 = arith.constant 32 : index
    %44 = vector.load %arg14[%c0_42, %c32] : memref<8x290xf32, #tpu.memory_space<vmem>>, vector<8x256xf32>
    %45 = vector.broadcast %0 : vector<1x256xf32> to vector<8x256xf32>
    %46 = arith.mulf %44, %45 : vector<8x256xf32>
    %c0_43 = arith.constant 0 : index
    %c33 = arith.constant 33 : index
    %47 = vector.load %arg14[%c0_43, %c33] : memref<8x290xf32, #tpu.memory_space<vmem>>, vector<8x256xf32>
    %c0_44 = arith.constant 0 : index
    %c34 = arith.constant 34 : index
    %48 = vector.load %arg14[%c0_44, %c34] : memref<8x290xf32, #tpu.memory_space<vmem>>, vector<8x256xf32>
    %49 = vector.broadcast %1 : vector<1x256xf32> to vector<8x256xf32>
    %50 = arith.mulf %48, %49 : vector<8x256xf32>
    %51 = tpu.concatenate %46, %47, %50 in 0 : vector<8x256xf32>, vector<8x256xf32>, vector<8x256xf32> -> vector<24x256xf32>
    %c0_45 = arith.constant 0 : index
    %c48 = arith.constant 48 : index
    %52 = vector.load %arg6[%c0_45, %c48] : memref<8x72xf32, #tpu.memory_space<vmem>>, vector<8x24xf32>
    %cst_46 = arith.constant dense<0.000000e+00> : vector<8x256xf32>
    %53 = tpu.matmul %52, %51, %cst_46 {dimension_numbers = #tpu.dot_dimension_numbers<[1], [0], [0], [1], [0, 0, 1, 1], [], []>} : vector<8x24xf32>, vector<24x256xf32>, vector<8x256xf32> -> vector<8x256xf32>
    %54 = arith.addf %43, %53 : vector<8x256xf32>
    %c0_47 = arith.constant 0 : index
    %c0_48 = arith.constant 0 : index
    %55 = vector.load %arg7[%c0_47, %c0_48] : memref<8x1xf32, #tpu.memory_space<vmem>>, vector<8x1xf32>
    %56 = vector.broadcast %55 : vector<8x1xf32> to vector<8x256xf32>
    %57 = arith.mulf %54, %56 : vector<8x256xf32>
    %c0_49 = arith.constant 0 : index
    %c0_50 = arith.constant 0 : index
    %58 = vector.load %arg8[%c0_49, %c0_50] : memref<8x1xf32, #tpu.memory_space<vmem>>, vector<8x1xf32>
    %59 = vector.broadcast %58 : vector<8x1xf32> to vector<8x256xf32>
    %60 = arith.addf %57, %59 : vector<8x256xf32>
    %cst_51 = arith.constant 0.000000e+00 : f32
    %61 = vector.broadcast %cst_51 : f32 to vector<8x256xf32>
    %62 = arith.cmpf ogt, %60, %61 : vector<8x256xf32>
    %cst_52 = arith.constant 0.00999999977 : f32
    %63 = vector.broadcast %cst_52 : f32 to vector<8x256xf32>
    %64 = arith.mulf %63, %60 : vector<8x256xf32>
    %65 = arith.select %62, %60, %64 : vector<8x256xi1>, vector<8x256xf32>
    %c0_53 = arith.constant 0 : index
    %c17_54 = arith.constant 17 : index
    %66 = vector.load %arg15[%c0_53, %c17_54] : memref<8x290xf32, #tpu.memory_space<vmem>>, vector<8x256xf32>
    tpu.vector_store %arg15[%c0_53, %c17_54], %65 {strides = array<i32>} : memref<8x290xf32, #tpu.memory_space<vmem>>, vector<8x256xf32>,
    %c0_55 = arith.constant 0 : index
    %c0_56 = arith.constant 0 : index
    %67 = vector.load %arg15[%c0_55, %c0_56] : memref<8x290xf32, #tpu.memory_space<vmem>>, vector<8x256xf32>
    %68 = vector.broadcast %0 : vector<1x256xf32> to vector<8x256xf32>
    %69 = arith.mulf %67, %68 : vector<8x256xf32>
    %c0_57 = arith.constant 0 : index
    %c1_58 = arith.constant 1 : index
    %70 = vector.load %arg15[%c0_57, %c1_58] : memref<8x290xf32, #tpu.memory_space<vmem>>, vector<8x256xf32>
    %c0_59 = arith.constant 0 : index
    %c2_60 = arith.constant 2 : index
    %71 = vector.load %arg15[%c0_59, %c2_60] : memref<8x290xf32, #tpu.memory_space<vmem>>, vector<8x256xf32>
    %72 = vector.broadcast %1 : vector<1x256xf32> to vector<8x256xf32>
    %73 = arith.mulf %71, %72 : vector<8x256xf32>
    %74 = tpu.concatenate %69, %70, %73 in 0 : vector<8x256xf32>, vector<8x256xf32>, vector<8x256xf32> -> vector<24x256xf32>
    %c0_61 = arith.constant 0 : index
    %c0_62 = arith.constant 0 : index
    %75 = vector.load %arg9[%c0_61, %c0_62] : memref<8x72xf32, #tpu.memory_space<vmem>>, vector<8x24xf32>
    %cst_63 = arith.constant dense<0.000000e+00> : vector<8x256xf32>
    %76 = tpu.matmul %75, %74, %cst_63 {dimension_numbers = #tpu.dot_dimension_numbers<[1], [0], [0], [1], [0, 0, 1, 1], [], []>} : vector<8x24xf32>, vector<24x256xf32>, vector<8x256xf32> -> vector<8x256xf32>
    %c0_64 = arith.constant 0 : index
    %c16_65 = arith.constant 16 : index
    %77 = vector.load %arg15[%c0_64, %c16_65] : memref<8x290xf32, #tpu.memory_space<vmem>>, vector<8x256xf32>
    %78 = vector.broadcast %0 : vector<1x256xf32> to vector<8x256xf32>
    %79 = arith.mulf %77, %78 : vector<8x256xf32>
    %c0_66 = arith.constant 0 : index
    %c17_67 = arith.constant 17 : index
    %80 = vector.load %arg15[%c0_66, %c17_67] : memref<8x290xf32, #tpu.memory_space<vmem>>, vector<8x256xf32>
    %c0_68 = arith.constant 0 : index
    %c18_69 = arith.constant 18 : index
    %81 = vector.load %arg15[%c0_68, %c18_69] : memref<8x290xf32, #tpu.memory_space<vmem>>, vector<8x256xf32>
    %82 = vector.broadcast %1 : vector<1x256xf32> to vector<8x256xf32>
    %83 = arith.mulf %81, %82 : vector<8x256xf32>
    %84 = tpu.concatenate %79, %80, %83 in 0 : vector<8x256xf32>, vector<8x256xf32>, vector<8x256xf32> -> vector<24x256xf32>
    %c0_70 = arith.constant 0 : index
    %c24_71 = arith.constant 24 : index
    %85 = vector.load %arg9[%c0_70, %c24_71] : memref<8x72xf32, #tpu.memory_space<vmem>>, vector<8x24xf32>
    %cst_72 = arith.constant dense<0.000000e+00> : vector<8x256xf32>
    %86 = tpu.matmul %85, %84, %cst_72 {dimension_numbers = #tpu.dot_dimension_numbers<[1], [0], [0], [1], [0, 0, 1, 1], [], []>} : vector<8x24xf32>, vector<24x256xf32>, vector<8x256xf32> -> vector<8x256xf32>
    %87 = arith.addf %76, %86 : vector<8x256xf32>
    %c0_73 = arith.constant 0 : index
    %c32_74 = arith.constant 32 : index
    %88 = vector.load %arg15[%c0_73, %c32_74] : memref<8x290xf32, #tpu.memory_space<vmem>>, vector<8x256xf32>
    %89 = vector.broadcast %0 : vector<1x256xf32> to vector<8x256xf32>
    %90 = arith.mulf %88, %89 : vector<8x256xf32>
    %c0_75 = arith.constant 0 : index
    %c33_76 = arith.constant 33 : index
    %91 = vector.load %arg15[%c0_75, %c33_76] : memref<8x290xf32, #tpu.memory_space<vmem>>, vector<8x256xf32>
    %c0_77 = arith.constant 0 : index
    %c34_78 = arith.constant 34 : index
    %92 = vector.load %arg15[%c0_77, %c34_78] : memref<8x290xf32, #tpu.memory_space<vmem>>, vector<8x256xf32>
    %93 = vector.broadcast %1 : vector<1x256xf32> to vector<8x256xf32>
    %94 = arith.mulf %92, %93 : vector<8x256xf32>
    %95 = tpu.concatenate %90, %91, %94 in 0 : vector<8x256xf32>, vector<8x256xf32>, vector<8x256xf32> -> vector<24x256xf32>
    %c0_79 = arith.constant 0 : index
    %c48_80 = arith.constant 48 : index
    %96 = vector.load %arg9[%c0_79, %c48_80] : memref<8x72xf32, #tpu.memory_space<vmem>>, vector<8x24xf32>
    %cst_81 = arith.constant dense<0.000000e+00> : vector<8x256xf32>
    %97 = tpu.matmul %96, %95, %cst_81 {dimension_numbers = #tpu.dot_dimension_numbers<[1], [0], [0], [1], [0, 0, 1, 1], [], []>} : vector<8x24xf32>, vector<24x256xf32>, vector<8x256xf32> -> vector<8x256xf32>
    %98 = arith.addf %87, %97 : vector<8x256xf32>
    %c0_82 = arith.constant 0 : index
    %c0_83 = arith.constant 0 : index
    %99 = vector.load %arg10[%c0_82, %c0_83] : memref<8x1xf32, #tpu.memory_space<vmem>>, vector<8x1xf32>
    %100 = vector.broadcast %99 : vector<8x1xf32> to vector<8x256xf32>
    %101 = arith.mulf %98, %100 : vector<8x256xf32>
    %c0_84 = arith.constant 0 : index
    %c0_85 = arith.constant 0 : index
    %102 = vector.load %arg11[%c0_84, %c0_85] : memref<8x1xf32, #tpu.memory_space<vmem>>, vector<8x1xf32>
    %103 = vector.broadcast %102 : vector<8x1xf32> to vector<8x256xf32>
    %104 = arith.addf %101, %103 : vector<8x256xf32>
    %cst_86 = arith.constant 0.000000e+00 : f32
    %105 = vector.broadcast %cst_86 : f32 to vector<8x256xf32>
    %106 = arith.cmpf ogt, %104, %105 : vector<8x256xf32>
    %cst_87 = arith.constant 0.00999999977 : f32
    %107 = vector.broadcast %cst_87 : f32 to vector<8x256xf32>
    %108 = arith.mulf %107, %104 : vector<8x256xf32>
    %109 = arith.select %106, %104, %108 : vector<8x256xi1>, vector<8x256xf32>
    %c0_88 = arith.constant 0 : index
    %c0_89 = arith.constant 0 : index
    %c0_90 = arith.constant 0 : index
    %110 = vector.load %arg13[%c0_88, %c0_89, %c0_90] : memref<1x8x256xf32, #tpu.memory_space<vmem>>, vector<1x8x256xf32>
    %111 = vector.shape_cast %110 : vector<1x8x256xf32> to vector<8x256xf32>
    %112 = vector.shape_cast %109 : vector<8x256xf32> to vector<1x8x256xf32>
    tpu.vector_store %arg13[%c0_88, %c0_89, %c0_90], %112 {strides = array<i32>} : memref<1x8x256xf32, #tpu.memory_space<vmem>>, vector<1x8x256xf32>,
    return
  }
  func.func @transform_0(%arg0: i32) -> (i32, i32, i32) {
    %c0_i32 = arith.constant 0 : i32
    %c0_i32_0 = arith.constant 0 : i32
    %c0_i32_1 = arith.constant 0 : i32
    return %arg0, %c0_i32, %c0_i32_0 : i32, i32, i32
  }
  func.func @transform_1(%arg0: i32) -> (i32, i32, i32) {
    %c0_i32 = arith.constant 0 : i32
    %c0_i32_0 = arith.constant 0 : i32
    %c0_i32_1 = arith.constant 0 : i32
    return %arg0, %c0_i32, %c0_i32_0 : i32, i32, i32
  }
  func.func @transform_2(%arg0: i32) -> (i32, i32) {
    %c0_i32 = arith.constant 0 : i32
    %c0_i32_0 = arith.constant 0 : i32
    %c0_i32_1 = arith.constant 0 : i32
    return %c0_i32, %c0_i32_0 : i32, i32
  }
  func.func @transform_3(%arg0: i32) -> (i32, i32) {
    %c0_i32 = arith.constant 0 : i32
    %c0_i32_0 = arith.constant 0 : i32
    %c0_i32_1 = arith.constant 0 : i32
    return %c0_i32, %c0_i32_0 : i32, i32
  }
  func.func @transform_4(%arg0: i32) -> (i32, i32) {
    %c0_i32 = arith.constant 0 : i32
    %c0_i32_0 = arith.constant 0 : i32
    %c0_i32_1 = arith.constant 0 : i32
    return %c0_i32, %c0_i32_0 : i32, i32
  }
  func.func @transform_5(%arg0: i32) -> (i32, i32) {
    %c0_i32 = arith.constant 0 : i32
    %c0_i32_0 = arith.constant 0 : i32
    %c0_i32_1 = arith.constant 0 : i32
    return %c0_i32, %c0_i32_0 : i32, i32
  }
  func.func @transform_6(%arg0: i32) -> (i32, i32) {
    %c0_i32 = arith.constant 0 : i32
    %c0_i32_0 = arith.constant 0 : i32
    %c0_i32_1 = arith.constant 0 : i32
    return %c0_i32, %c0_i32_0 : i32, i32
  }
  func.func @transform_7(%arg0: i32) -> (i32, i32) {
    %c0_i32 = arith.constant 0 : i32
    %c0_i32_0 = arith.constant 0 : i32
    %c0_i32_1 = arith.constant 0 : i32
    return %c0_i32, %c0_i32_0 : i32, i32
  }
  func.func @transform_8(%arg0: i32) -> (i32, i32) {
    %c0_i32 = arith.constant 0 : i32
    %c0_i32_0 = arith.constant 0 : i32
    %c0_i32_1 = arith.constant 0 : i32
    return %c0_i32, %c0_i32_0 : i32, i32
  }
  func.func @transform_9(%arg0: i32) -> (i32, i32) {
    %c0_i32 = arith.constant 0 : i32
    %c0_i32_0 = arith.constant 0 : i32
    %c0_i32_1 = arith.constant 0 : i32
    return %c0_i32, %c0_i32_0 : i32, i32
  }
  func.func @transform_10(%arg0: i32) -> (i32, i32) {
    %c0_i32 = arith.constant 0 : i32
    %c0_i32_0 = arith.constant 0 : i32
    %c0_i32_1 = arith.constant 0 : i32
    return %c0_i32, %c0_i32_0 : i32, i32
  }
  func.func @transform_11(%arg0: i32) -> (i32, i32) {
    %c0_i32 = arith.constant 0 : i32
    %c0_i32_0 = arith.constant 0 : i32
    %c0_i32_1 = arith.constant 0 : i32
    return %c0_i32, %c0_i32_0 : i32, i32
  }
  func.func @transform_12(%arg0: i32) -> (i32, i32, i32) {
    %c0_i32 = arith.constant 0 : i32
    %c0_i32_0 = arith.constant 0 : i32
    %c0_i32_1 = arith.constant 0 : i32
    return %arg0, %c0_i32, %c0_i32_0 : i32, i32, i32
  }
}

</mosaic_0001>

<bundles_post_ra>
// kernel: tpu_custom_call.1
= control target key start
LH: loop header
LB: loop body
LE: loop exit
PB: predicated region body
PF: predicated region fallthrough
CT: control target
= control target key end

     0   :  { %s2295_s0 = inlined_call_operand.vmem [shape: f32[2,8,64], index: 0, kind: input, shape index: {}]   ;;  %s2296_s1 = inlined_call_operand.vmem [shape: f32[2,4,256], index: 1, kind: input, shape index: {}]   ;;  %s2297_s2 = inlined_call_operand.vmem [shape: f32[4,8], index: 2, kind: input, shape index: {}]   ;;  %s2298_s3 = inlined_call_operand.vmem [shape: f32[4,1], index: 3, kind: input, shape index: {}]   ;;  %s2299_s4 = inlined_call_operand.hbm [shape: f32[64,256], index: 4, kind: input, shape index: {}]   ;;  %s2300_s5 = inlined_call_operand.hbm [shape: f32[8,72], index: 5, kind: input, shape index: {}]   ;;  %s2301_s6 = inlined_call_operand.vmem [shape: f32[8,1], index: 6, kind: input, shape index: {}]   ;;  %s2302_s7 = inlined_call_operand.vmem [shape: f32[8,1], index: 7, kind: input, shape index: {}]   ;;  %s2303_s8 = inlined_call_operand.hbm [shape: f32[8,72], index: 8, kind: input, shape index: {}]   ;;  %s2304_s9 = inlined_call_operand.vmem [shape: f32[8,1], index: 9, kind: input, shape index: {}]   ;;  %s2305_s10 = inlined_call_operand.vmem [shape: f32[8,1], index: 10, kind: input, shape index: {}]   ;;  %s2306_s11 = inlined_call_operand.vmem [shape: f32[2,256], index: 11, kind: input, shape index: {}]   ;;  %s2307_s12 = inlined_call_operand.hbm [shape: f32[2,8,256], index: 12, kind: output, shape index: {}]  }
   0x1   :  { %2311 = sst [smem:[#allocation17_spill]] %s2299_s4 }
   0x2   :  { %2312 = sst [smem:[#allocation18_spill]] %s2300_s5 }
   0x3   :  { %17 = vsyncpa [#allocation5], 0 }
   0x4   :  { %18 = vsyncpa [#allocation8], 0 }
   0x5   :  { %19 = vsyncpa [#allocation6], 0 }
   0x6   :  { %21 = vsyncpa [#allocation6 + $0x1], 0  ;;  %s1886_s21 = smov 0   ;;  %s1888_s22 = smov 0  }
   0x7   :  { %s1890_s23 = smov 0   ;;  %s1892_s24 = smov 0  }
   0x8 LB: > { %2313 = sst [smem:[#allocation14_spill]] %s1796_s23  ;;  %s1907_s25 = sadd.s32 4294967295, %s1800_s24   ;;  %s1800_s24 = sphi %s1892_s24, %s2322_s24   ;;  %s1796_s23 = sphi %s1890_s23, %s2324_s23   ;;  %s1792_s22 = sphi %s1888_s22, %s2326_s22   ;;  %s1788_s21 = sphi %s1886_s21, %s2325_s21  }
   0x9   : > { %s1384_s26 = sadd.s32 4294967294, %s1800_s24   ;;  %s1911_s27 = sadd.s32 1, %s1800_s24  }
   0xa   : > { %2314 = sst [smem:[#allocation15_spill]] %s1911_s27  ;;  %s296_s28 = sadd.s32 1, %s1796_s23 }
   0xb   : > { %s293_s29 = ssub.s32 %s1800_s24, %s1911_s27  ;;  %p306_p0 = scmp.ne.s32.totalorder %s1796_s23, %s1792_s22 }
   0xc   : > { %p294_p1 = scmp.eq.s32.totalorder %s293_s29, 0  ;;  %p307_p2 = scmp.eq.s32.totalorder %s1907_s25, 1 }
   0xd   : > { %p312_p3 = scmp.ne.s32.totalorder %s1792_s22, %s1788_s21  ;;  %p313_p4 = scmp.eq.s32.totalorder %s1384_s26, 1 }
   0xe   : > { %s1922_s30 = scalar_select %p294_p1, %s1796_s23, %s296_s28  }
   0xf   : > { %p1924_p5 = por %p307_p2, %p306_p0  ;;  %p1928_p6 = por %p313_p4, %p312_p3 }
  0x10   : > { %2315 = sst [smem:[#allocation16_spill]] %s1922_s30  ;;  %p1385_p7 = scmp.ge.s32.totalorder %s1800_s24, 1 }
  0x11   : > { %p320_p8 = scmp.lt.s32.totalorder %s1800_s24, 3  ;;  %p1449_p9 = scmp.eq.s32.totalorder %s1907_s25, 0 }
  0x12   : > { %s2319_s5 = sld [smem:[#allocation18_spill]]  ;;  %s1802_s19 = smov [#allocation7]  }
  0x13   : > { %p1935_p10 = pnand %p1385_p7, %p320_p8  ;;  %s354_s20 = sshll.u32 %s1802_s19, 4  ;;  %s355_s20 = int_to_ptr.vmem [resolvable:$true] %s354_s20 }
  0x14   : > { %s2320_s4 = sld [smem:[#allocation17_spill]]  ;;  %s1803_s16 = smov [#allocation4]  }
  0x15   : > { %p1435_p11 = pneg %p1935_p10  ;;  %s339_s17 = sshll.u32 %s1803_s16, 4  ;;  %s340_s17 = int_to_ptr.vmem [resolvable:$true] %s339_s17 }
  0x16   : > { %s1804_s19 = smov 256   ;;  %s1806_s23 = smov [#allocation9]  }
  0x17   : > { %p1949_p12 = pnand %p1449_p9, %p1435_p11  ;;  %s372_s27 = sshll.u32 %s1806_s23, 4  ;;  %s373_s27 = int_to_ptr.vmem [resolvable:$true] %s372_s27 }
  0x18   : > { %s352_s18 = sshll.u32 %s2319_s5, 4  ;;  %s1805_s5 = smov 16   ;;  %s353_s18 = int_to_ptr.hbm [resolvable:$true] %s352_s18 }
  0x19   : > { %1441 = dma.hbm_to_vmem [thread:$0]  (!%p1949_p12), %s353_s18, 128, %s355_s20, [#allocation8]  }
  0x1a   : > { %s337_s29 = sshll.u32 %s2320_s4, 4  ;;  %s370_s4 = sshll.u32 %s2303_s8, 4  ;;  %s338_s29 = int_to_ptr.hbm [resolvable:$true] %s337_s29  ;;  %s371_s4 = int_to_ptr.hbm [resolvable:$true] %s370_s4 }
  0x1b   : > { %1438 = dma.hbm_to_vmem [thread:$0]  (!%p1949_p12), %s338_s29, 2048, %s340_s17, [#allocation5], %s1804_s19, %s1804_s19, %s1805_s5  }
  0x1c   : > { %1444 = dma.hbm_to_vmem [thread:$0]  (!%p1949_p12), %s371_s4, 128, %s373_s27, [#allocation8]  }
  0x1d   : > { %409 = sbr.rel (%p1935_p10) target bundleno = 1367 (0x557), region = 68 }
  0x22   : > { %1775 = dma.done.wait (%p1449_p9), [#allocation5], 2048  }
  0x23   : > { %1777 = vsyncadd (%p1449_p9), [#allocation5], 4294965248 }
  0x24   : > { %1779 = dma.done.wait (%p1449_p9), [#allocation8], 256  }
  0x25   : > { %1781 = vsyncadd (%p1449_p9), [#allocation8], 4294967040  ;;  %p466_p13 = scmp.lt.s32.totalorder %s1907_s25, 1  ;;  %vm486_vm0 = vcmask 64512   ;;  %v484_v2 = vld [vmem:[%s2297_s2] sm:$0xf] }
  0x26   : > { %v524_v3 = vld [vmem:[#allocation4 + $0x70] sm:$0xff]  ;;  %v525_v4 = vld [vmem:[#allocation4 + $0x78] sm:$0xff]  ;;  %v522_v5 = vld [vmem:[#allocation4 + $0x60] sm:$0xff]  ;;  %v1807_v21 = vmov 0   ;;  %s1808_s26 = smov 17   ;;  %vm532_vm1 = vcmask 523264  }
  0x27   : > { %s467_s5 = scalar_select %p466_p13, %s1907_s25, 1  ;;  %544 = vmatpush.msra.mxu1 %v524_v3  ;;  %v523_v6 = vld [vmem:[#allocation4 + $0x68] sm:$0xff]  ;;  %564 = vmatpush.msra.mxu2 %v525_v4  ;;  %v520_v7 = vld [vmem:[#allocation4 + $0x50] sm:$0xff]  ;;  %v521_v8 = vld [vmem:[#allocation4 + $0x58] sm:$0xff]  ;;  %vm480_vm2 = vcmask 277640   ;;  %vm592_vm3 = vcmask 134144  }
  0x28   : > { %v518_v9 = vld [vmem:[#allocation4 + $0x40] sm:$0xff]  ;;  %v519_v10 = vld [vmem:[#allocation4 + $0x48] sm:$0xff]  ;;  %v516_v11 = vld [vmem:[#allocation4 + $0x30] sm:$0xff]  ;;  %1507 = vset.pattern.permute.xlu0 %v1807_v21  ;;  %1573 = vset.pattern.permute.xlu1 %v1807_v21  ;;  %vm478_vm4 = vcmask 138240   ;;  %v1810_v28 = vmov 0.0   ;;  %vm589_vm5 = vcmask 1043592  }
  0x29   : > { %s1395_s4 = sshll.u32 %s467_s5, 3  ;;  %545 = vmatpush.msra.mxu1 %v522_v5  ;;  %565 = vmatpush.msra.mxu2 %v523_v6  ;;  %v517_v12 = vld [vmem:[#allocation4 + $0x38] sm:$0xff]  ;;  %v514_v13 = vld [vmem:[#allocation4 + $0x20] sm:$0xff]  ;;  %v515_v14 = vld [vmem:[#allocation4 + $0x28] sm:$0xff]  ;;  %481 = vst.msk [vmem:[#allocation2 + $0x10] sm:$0xff] %vm480_vm2, %v1810_v28  ;;  %s1811_s23 = smov 34  }
  0x2a   : > { %s469_s30 = scalar_lea.vmem %s2295_s0, %s1395_s4  ;;  %s474_s20 = scalar_lea.vmem %s2296_s1, %s1395_s4  ;;  %v512_v15 = vld [vmem:[#allocation4 + $0x10] sm:$0xff]  ;;  %v513_v16 = vld [vmem:[#allocation4 + $0x18] sm:$0xff]  ;;  %v510_v17 = vld [vmem:[#allocation4] sm:$0xff]  ;;  %1574 = vset.pattern.permute.xlu2 %v1807_v21  ;;  %483 = vst.msk [vmem:[#allocation3 + $0x10] sm:$0xff] %vm480_vm2, %v1810_v28  ;;  %vm609_vm6 = vcmask 138244   ;;  %vm606_vm7 = vcmask 1047692  }
  0x2b   : > { %v485_v0 = vld [vmem:[%s469_s30] sm:$0xff]  ;;  %546 = vmatpush.msra.mxu1 %v520_v7  ;;  %566 = vmatpush.msra.mxu2 %v521_v8  ;;  %s1809_s4 = smov 18   ;;  %479 = vst.msk [vmem:[#allocation2] sm:$0xff] %vm478_vm4, %v1810_v28  ;;  %s1812_s15 = smov 16   ;;  %vm681_vm8 = vcmask 146432   ;;  %vm838_vm9 = vcmask 277504  }
  0x2c   : > { %v576_v1 = vld [vmem:[%s474_s20] sm:$0xff]  ;;  %505 = vmatpush.msra.mxu0 %v485_v0  ;;  %482 = vst.msk [vmem:[#allocation3] sm:$0xff] %vm478_vm4, %v1810_v28  ;;  %s1813_s18 = smov 127   ;;  %s1814_s20 = smov 126   ;;  %v2059_v63 = vld [vmem:[#allocation7] sm:$0xff]  ;;  %vm669_vm10 = vcmask 130048  }
  0x2d   : > { %578 = vst [vmem:[#allocation1] ss:$2 sm:$0xff] %v576_v1  ;;  %1399 = vmatmul.msk.f32.vlgmr.msra.gmra.mxu0 %vm486_vm0, %v484_v2  ;;  %547 = vmatpush.msra.mxu1 %v518_v9  ;;  %v511_v18 = vld [vmem:[#allocation4 + $0x8] sm:$0xff]  ;;  %s1815_s29 = smov 2   ;;  %s1816_s16 = smov 32   ;;  %vm659_vm11 = vcmask 1031168  }
  0x2e   : > { %567 = vmatpush.msra.mxu2 %v519_v10  ;;  %v526_v19 = vld [vmem:[%s2298_s3] sm:$0xf]  ;;  %s1817_s17 = smov 104   ;;  %s1818_s19 = smov 112   ;;  %vm645_vm12 = vcmask 1039360   ;;  %vm628_vm13 = vcmask 15360  }
  0x2f   : > { %548 = vmatpush.msra.mxu1 %v516_v11  ;;  %529 = vperm.xlu0 %1507, %v526_v19   ;;  %v1398_v23 = vld [vmem:[%s2306_s11 + $0x1] ss:$2 sm:$0x3]  ;;  %v475_v38 = vld [vmem:[%s2306_s11] ss:$2 sm:$0x3] }
  0x30   : > { %568 = vmatpush.msra.mxu2 %v517_v12  ;;  %v1991_v24 = vperm.slane %v1398_v23, 1  ;;  %v622_v37 = vperm.slane %v1398_v23, 0  ;;  %v2003_v39 = vperm.slane %v475_v38, 0  ;;  %v2043_v58 = vperm.slane %v475_v38, 1  ;;  %s1819_s28 = smov 96   ;;  %s1820_s5 = smov 80  }
  0x31   : > { %549 = vmatpush.msra.mxu1 %v514_v13  ;;  %vm826_vm14 = vcmask 261120   ;;  %vm724_vm15 = vcmask 916480   ;;  %vm737_vm0 = vcmask 195584  }
  0x32   : > { %569 = vmatpush.msra.mxu2 %v515_v14 }
  0x33   : > { %550 = vmatpush.msra.mxu1 %v512_v15 }
  0x34   : > { %570 = vmatpush.msra.mxu2 %v513_v16  ;;  %v580_v20 = vld.sshfl [vmem:[#allocation1 + $0x8] sm:$0xff pattern:$0x75316420]  ;;  %v579_v22 = vld.sshfl [vmem:[#allocation1] sm:$0xff pattern:$0x75316420] }
  0x35   : > { %551 = vmatpush.msra.mxu1 %v510_v17  ;;  %583 = vrot.lane.b32.xlu1 %v580_v20, %s1808_s26 }
  0x36   : > { %571 = vmatpush.msra.mxu2 %v511_v18 }
  0x37   : > { %581 = vrot.lane.b32.xlu0 %v579_v22, %s1808_s26 }
  0x3f   : > { %679 = vrot.lane.b32.xlu0 %v1991_v24, %s1809_s4 }
  0xa1   : > { %v530_v26 = vpop.permute.xlu0 %529 }
  0xa7   : > { %v584_v27 = vpop.permute.xlu1 %583 }
  0xa8   : > { %593 = vst.msk [vmem:[#allocation2 + $0x10] sm:$0xf] %vm592_vm3, %v584_v27 }
  0xa9   : > { %v582_v29 = vpop.permute.xlu0 %581 }
  0xaa   : > { %v507_v25 = vpop.f32.mrf.mxu0  ;;  %v585_v30 = vsel %vm478_vm4, %v582_v29, %v584_v27  ;;  %590 = vst.msk [vmem:[#allocation2] sm:$0xf] %vm589_vm5, %v582_v29  ;;  %vm969_vm5 = vcmask 1047688  }
  0xab   : > { %1400 = vmatmul.msk.f32.vlgmr.msra.gmra.mxu1 %vm532_vm1, %v507_v25  ;;  %1401 = vmatmul.msk.f32.vlgmr.msra.gmra.mxu2 %vm532_vm1, %v507_v25  ;;  %591 = vst [vmem:[#allocation2 + $0x8] sm:$0xf] %v585_v30  ;;  %vm880_vm1 = vcmask 785408  }
  0xb1   : > { %v2014_v44 = vpop.permute.xlu0 %679 }
 0x128   : > { %v553_v31 = vpop.f32.mrf.mxu1 }
 0x129   : > { %v554_v32 = vadd.f32 %v553_v31, %v530_v26 }
 0x12b   : > { %v596_v33 = vrot.slane %v554_v32, 4 }
 0x12d   : > { %598 = vrot.lane.b32.xlu1 %v596_v33, %s1808_s26 }
 0x12e   : > { %v573_v34 = vpop.f32.mrf.mxu2 }
 0x12f   : > { %v574_v35 = vadd.f32 %v573_v34, %v530_v26 }
 0x131   : > { %v597_v36 = vrot.slane %v574_v35, 4 }
 0x133   : > { %600 = vrot.lane.b32.xlu2 %v597_v36, %s1808_s26 }
 0x135   : > { %834 = vrot.lane.b32.xlu1 %v622_v37, %s1811_s23 }
 0x13b   : > { %677 = vrot.lane.b32.xlu2 %v622_v37, %s1809_s4 }
 0x13d   : > { %665 = vrot.lane.b32.xlu1 %v2003_v39, %s1812_s15 }
 0x143   : > { %836 = vrot.lane.b32.xlu2 %v1991_v24, %s1811_s23 }
 0x18d   : > { %v601_v40 = vpop.permute.xlu2 %600 }
 0x18e   : > { %610 = vst.msk [vmem:[#allocation2 + $0x10] sm:$0xf0] %vm609_vm6, %v601_v40 }
 0x195   : > { %v2009_v41 = vld [vmem:[#allocation2 + $0x10] sm:$0xff]  ;;  %v2016_v45 = vpop.permute.xlu2 %677 }
 0x196   : > { %643 = vrot.lane.b32.xlu0 %v2009_v41, %s1813_s18  ;;  %v2020_v46 = vsel %vm681_vm8, %v2016_v45, %v2014_v44  ;;  %v688_v49 = vmul.f32 %v2014_v44, %v2009_v41 }
 0x19d   : > { %v2041_v57 = vpop.permute.xlu2 %836 }
 0x19e   : > { %v845_v61 = vmul.f32 %v2041_v57, %v2009_v41 }
 0x19f   : > { %v599_v42 = vpop.permute.xlu1 %598 }
 0x1a0   : > { %v602_v43 = vsel %vm478_vm4, %v599_v42, %v601_v40  ;;  %607 = vst.msk [vmem:[#allocation2] sm:$0xf0] %vm606_vm7, %v599_v42 }
 0x1a1   : > { %608 = vst [vmem:[#allocation2 + $0x8] sm:$0xf0] %v602_v43 }
 0x1a7   : > { %v2022_v47 = vld [vmem:[#allocation2] sm:$0xff]  ;;  %v2024_v48 = vpop.permute.xlu1 %834 }
 0x1a8   : > { %v2028_v50 = vld [vmem:[#allocation2 + $0x8] sm:$0xff]  ;;  %v843_v51 = vmul.f32 %v2024_v48, %v2022_v47  ;;  %v686_v52 = vmul.f32 %v2016_v45, %v2022_v47  ;;  %v2047_v59 = vsel %vm838_vm9, %v2024_v48, %v2041_v57 }
 0x1a9   : > { %v1508_v53 = vpack.i.bf16 %v2028_v50, %v2022_v47  ;;  %v687_v54 = vmul.f32 %v2020_v46, %v2028_v50  ;;  %v844_v60 = vmul.f32 %v2047_v59, %v2028_v50 }
 0x1aa   : > { %v1513_v55 = vpack.i.bf16 %v843_v51, %v688_v49 }
 0x1ab   : > { %1509 = vrot.lane.b32.xlu2 %v1508_v53, %s1813_s18  ;;  %v1518_v56 = vpack.i.bf16 %v687_v54, %v686_v52  ;;  %v1523_v62 = vpack.i.bf16 %v845_v61, %v844_v60 }
 0x1ac   : > { %1514 = vrot.lane.b32.xlu1 %v1513_v55, %s1814_s20 }
 0x1ad   : > { %1519 = vrot.lane.b32.xlu0 %v1518_v56, %s1814_s20 }
 0x1af   : > { %v2063_v1 = vpop.permute.xlu1 %665 }
 0x1b0   : > { %v674_v4 = vmul.f32 %v2063_v1, %v2022_v47 }
 0x1b3   : > { %667 = vrot.lane.b32.xlu2 %v2043_v58, %s1812_s15 }
 0x1b4   : > { %626 = vrot.lane.b32.xlu1 %v1991_v24, %s1815_s29 }
 0x1b5   : > { %624 = vrot.lane.b32.xlu0 %v622_v37, %s1815_s29  ;;  %s463_s29 = sand.u32 1, %s1792_s22  }
 0x1bb   : > { %1524 = vrot.lane.b32.xlu2 %v1523_v62, %s1814_s20 }
 0x1bc   : > { %824 = vrot.lane.b32.xlu1 %v2043_v58, %s1816_s16 }
 0x1bd   : > { %822 = vrot.lane.b32.xlu0 %v2003_v39, %s1816_s16  ;;  %s1394_s16 = sshll.u32 %s463_s29, 4 }
 0x1be   : > { %s465_s4 = scalar_lea.vmem [#allocation10], %s1394_s16 }
 0x1bf   : > { %s1279_s23 = sshll.u32 %s465_s4, 4  ;;  %s1280_s23 = int_to_ptr.vmem [resolvable:$true] %s1279_s23 }
 0x1c3   : > { %701 = vrot.lane.b32.xlu2 %v2059_v63, %s1817_s17 }
 0x205   : > { %v1510_v0 = vpop.permute.xlu2 %1509 }
 0x206   : > { %v1512_v14 = vunpack.i.h.bf16 %v1510_v0  ;;  %v1511_v15 = vunpack.i.l.bf16 %v1510_v0 }
 0x208   : > { %v644_v7 = vpop.permute.xlu0 %643  ;;  %v2086_v21 = vsel %vm645_vm12, %v1511_v15, %v1512_v14 }
 0x209   : > { %v2081_v19 = vsel %vm645_vm12, %v1512_v14, %v644_v7 }
 0x20a   : > { %v1553_v26 = vpack.i.bf16 %v2081_v19, %v2086_v21 }
 0x20d   : > { %v2065_v2 = vpop.permute.xlu2 %667 }
 0x20e   : > { %v2069_v3 = vsel %vm669_vm10, %v2063_v1, %v2065_v2  ;;  %v676_v27 = vmul.f32 %v2065_v2, %v2009_v41 }
 0x20f   : > { %v675_v5 = vmul.f32 %v2069_v3, %v2028_v50 }
 0x211   : > { %v1528_v6 = vpack.i.bf16 %v675_v5, %v674_v4 }
 0x213   : > { %1529 = vrot.lane.b32.xlu1 %v1528_v6, %s1818_s19 }
 0x215   : > { %v1525_v29 = vpop.permute.xlu2 %1524 }
 0x216   : > { %v1527_v32 = vunpack.i.h.bf16 %v1525_v29  ;;  %v1526_v33 = vunpack.i.l.bf16 %v1525_v29 }
 0x218   : > { %v856_v37 = vsel %vm659_vm11, %v1526_v33, %v1527_v32  ;;  %v1568_v38 = vpack.i.bf16 %v644_v7, %v1527_v32 }
 0x21d   : > { %v702_v53 = vpop.permute.xlu2 %701 }
 0x21e   : > { %v1515_v8 = vpop.permute.xlu1 %1514 }
 0x21f   : > { %v1516_v9 = vunpack.i.l.bf16 %v1515_v8  ;;  %v1520_v10 = vpop.permute.xlu0 %1519  ;;  %v1517_v31 = vunpack.i.h.bf16 %v1515_v8 }
 0x220   : > { %v1522_v11 = vunpack.i.h.bf16 %v1520_v10  ;;  %v1521_v12 = vunpack.i.l.bf16 %v1520_v10 }
 0x221   : > { %v1543_v13 = vpack.i.bf16 %v644_v7, %v1516_v9  ;;  %v855_v34 = vsel %vm659_vm11, %v1517_v31, %v1526_v33  ;;  %v945_v7 = vld [vmem:[%s2302_s7] sm:$0xff] }
 0x222   : > { %v698_v16 = vsel %vm659_vm11, %v1521_v12, %v1522_v11  ;;  %v699_v17 = vsel %vm659_vm11, %v1522_v11, %v1516_v9  ;;  %v1558_v40 = vpack.i.bf16 %v856_v37, %v855_v34  ;;  %v618_v34 = vmul.f32 %v2003_v39, %v2022_v47 }
 0x223   : > { %1544 = vrot.lane.b32.xlu1 %v1543_v13, %s1818_s19  ;;  %v1548_v18 = vpack.i.bf16 %v699_v17, %v698_v16 }
 0x225   : > { %1549 = vrot.lane.b32.xlu2 %v1548_v18, %s1818_s19 }
 0x226   : > { %v2083_v20 = vpop.permute.xlu1 %626 }
 0x227   : > { %v2088_v22 = vpop.permute.xlu0 %624  ;;  %v635_v30 = vmul.f32 %v2083_v20, %v2009_v41 }
 0x228   : > { %v2092_v23 = vsel %vm628_vm13, %v2088_v22, %v2083_v20  ;;  %v633_v24 = vmul.f32 %v2088_v22, %v2022_v47 }
 0x229   : > { %v634_v25 = vmul.f32 %v2092_v23, %v2028_v50 }
 0x22b   : > { %1554 = vrot.lane.b32.xlu1 %v1553_v26, %s1819_s28  ;;  %v1533_v28 = vpack.i.bf16 %v634_v25, %v633_v24 }
 0x22d   : > { %1534 = vrot.lane.b32.xlu0 %v1533_v28, %s1814_s20  ;;  %710 = vrot.lane.b32.xlu2 %v676_v27, %s1818_s19 }
 0x22e   : > { %v2112_v35 = vpop.permute.xlu1 %824 }
 0x22f   : > { %v2114_v36 = vpop.permute.xlu0 %822  ;;  %v833_v52 = vmul.f32 %v2112_v35, %v2009_v41  ;;  %v937_v41 = vld [vmem:[%s2301_s6] sm:$0xff] }
 0x230   : > { %v2119_v42 = vsel %vm826_vm14, %v2114_v36, %v2112_v35  ;;  %v831_v43 = vmul.f32 %v2114_v36, %v2022_v47 }
 0x231   : > { %v832_v49 = vmul.f32 %v2119_v42, %v2028_v50 }
 0x233   : > { %857 = vrot.lane.b32.xlu1 %v2059_v63, %s1820_s5  ;;  %v1563_v51 = vpack.i.bf16 %v832_v49, %v831_v43 }
 0x235   : > { %1539 = vrot.lane.b32.xlu0 %v1553_v26, %s1818_s19  ;;  %657 = vrot.lane.b32.xlu2 %v635_v30, %s1814_s20 }
 0x23b   : > { %940 = vperm.xlu1 %1573, %v937_v41  }
 0x23d   : > { %1559 = vrot.lane.b32.xlu0 %v1558_v40, %s1819_s28  ;;  %1569 = vrot.lane.b32.xlu2 %v1568_v38, %s1819_s28  ;;  %v619_v40 = vmul.f32 %v2043_v58, %v2028_v50 }
 0x245   : > { %1564 = vrot.lane.b32.xlu0 %v1563_v51, %s1819_s28  ;;  %948 = vperm.xlu2 %1574, %v945_v7  }
 0x24d   : > { %866 = vrot.lane.b32.xlu0 %v833_v52, %s1819_s28 }
 0x27f   : > { %v1550_v54 = vpop.permute.xlu2 %1549 }
 0x280   : > { %v1552_v55 = vunpack.i.h.bf16 %v1550_v54  ;;  %v1551_v56 = vunpack.i.l.bf16 %v1550_v54 }
 0x282   : > { %v729_v60 = vsel %vm724_vm15, %v1551_v56, %v1552_v55 }
 0x283   : > { %753 = vmatpush.msra.mxu3 %v729_v60 }
 0x285   : > { %v1530_v61 = vpop.permute.xlu1 %1529 }
 0x286   : > { %v1532_v9 = vunpack.i.h.bf16 %v1530_v61  ;;  %v1531_v11 = vunpack.i.l.bf16 %v1530_v61 }
 0x287   : > { %v711_v5 = vpop.permute.xlu2 %710 }
 0x288   : > { %v725_v24 = vsel %vm724_vm15, %v1531_v11, %v1532_v9  ;;  %v726_v25 = vsel %vm724_vm15, %v1532_v9, %v711_v5 }
 0x28f   : > { %v658_v8 = vpop.permute.xlu2 %657 }
 0x295   : > { %v1545_v62 = vpop.permute.xlu1 %1544 }
 0x296   : > { %v1546_v0 = vunpack.i.l.bf16 %v1545_v62  ;;  %v1547_v12 = vunpack.i.h.bf16 %v1545_v62 }
 0x297   : > { %v1570_v26 = vpop.permute.xlu2 %1569 }
 0x298   : > { %v730_v4 = vsel %vm724_vm15, %v1552_v55, %v1546_v0  ;;  %v1571_v31 = vunpack.i.l.bf16 %v1570_v26  ;;  %v1572_v51 = vunpack.i.h.bf16 %v1570_v26 }
 0x299   : > { %773 = vmatpush.msrb.mxu0 %v730_v4 }
 0x29d   : > { %v1555_v27 = vpop.permute.xlu1 %1554 }
 0x29e   : > { %v1557_v37 = vunpack.i.h.bf16 %v1555_v27  ;;  %v1556_v38 = vunpack.i.l.bf16 %v1555_v27 }
 0x29f   : > { %v1535_v6 = vpop.permute.xlu0 %1534  ;;  %v949_v7 = vpop.permute.xlu2 %948 }
 0x2a0   : > { %v1537_v15 = vunpack.i.h.bf16 %v1535_v6  ;;  %v1536_v16 = vunpack.i.l.bf16 %v1535_v6  ;;  %v883_v47 = vsel %vm880_vm1, %v1556_v38, %v1557_v37  ;;  %v884_v52 = vsel %vm880_vm1, %v1557_v37, %v1572_v51 }
 0x2a2   : > { %v660_v28 = vsel %vm659_vm11, %v1536_v16, %v1537_v15  ;;  %v661_v29 = vsel %vm659_vm11, %v1537_v15, %v658_v8 }
 0x2a5   : > { %v858_v54 = vpop.permute.xlu1 %857 }
 0x2a7   : > { %v1540_v10 = vpop.permute.xlu0 %1539 }
 0x2a8   : > { %v1542_v13 = vunpack.i.h.bf16 %v1540_v10  ;;  %v1541_v14 = vunpack.i.l.bf16 %v1540_v10 }
 0x2aa   : > { %v727_v17 = vsel %vm724_vm15, %v1541_v14, %v1542_v13  ;;  %v728_v18 = vsel %vm724_vm15, %v1542_v13, %v1547_v12 }
 0x2ab   : > { %754 = vmatpush.msra.mxu3 %v727_v17  ;;  %774 = vmatpush.msrb.mxu0 %v728_v18 }
 0x2ad   : > { %755 = vmatpush.msra.mxu3 %v725_v24  ;;  %775 = vmatpush.msrb.mxu0 %v726_v25  ;;  %v941_v5 = vpop.permute.xlu1 %940 }
 0x2ae   : > { %1402 = vmatmul.msk.f32.vlgmr.msra.gmra.mxu3 %vm737_vm0, %v702_v53  ;;  %1403 = vmatmul.msk.f32.vlgmr.msrb.gmra.mxu0 %vm737_vm0, %v702_v53 }
 0x2af   : > { %795 = vmatpush.msrb.mxu3 %v660_v28  ;;  %815 = vmatpush.msra.mxu0 %v661_v29  ;;  %v1560_v30 = vpop.permute.xlu0 %1559 }
 0x2b0   : > { %v1562_v32 = vunpack.i.h.bf16 %v1560_v30  ;;  %v1561_v33 = vunpack.i.l.bf16 %v1560_v30 }
 0x2b1   : > { %796 = vmatpush.msrb.mxu3 %v2086_v21  ;;  %816 = vmatpush.msra.mxu0 %v2081_v19 }
 0x2b2   : > { %v885_v43 = vsel %vm880_vm1, %v1561_v33, %v1562_v32  ;;  %v886_v49 = vsel %vm880_vm1, %v1562_v32, %v1571_v31 }
 0x2b3   : > { %797 = vmatpush.msrb.mxu3 %v618_v34  ;;  %817 = vmatpush.msra.mxu0 %v619_v40 }
 0x2b4   : > { %928 = vmatpush.msrb.mxu1 %v886_v49 }
 0x2b5   : > { %908 = vmatpush.msra.mxu3 %v885_v43  ;;  %v1007_v43 = vld [vmem:[#allocation9] sm:$0xff] }
 0x2b6   : > { %929 = vmatpush.msrb.mxu1 %v884_v52  ;;  %1404 = vmatmul.msk.f32.vlgmr.msrb.gmra.mxu3 %vm737_vm0, %v2059_v63 }
 0x2b7   : > { %909 = vmatpush.msra.mxu3 %v883_v47  ;;  %1405 = vmatmul.msk.f32.vlgmr.msra.gmra.mxu0 %vm737_vm0, %v2059_v63  ;;  %v1565_v50 = vpop.permute.xlu0 %1564 }
 0x2b8   : > { %v1567_v19 = vunpack.i.h.bf16 %v1565_v50  ;;  %v1566_v21 = vunpack.i.l.bf16 %v1565_v50 }
 0x2ba   : > { %v881_v53 = vsel %vm880_vm1, %v1566_v21, %v1567_v19 }
 0x2bb   : > { %910 = vmatpush.msra.mxu3 %v881_v53 }
 0x2be   : > { %1406 = vmatmul.msk.f32.vlgmr.msra.gmra.mxu3 %vm737_vm0, %v858_v54 }
 0x2bf   : > { %v867_v55 = vpop.permute.xlu0 %866 }
 0x2c0   : > { %v882_v56 = vsel %vm880_vm1, %v1567_v19, %v867_v55 }
 0x2c1   : > { %930 = vmatpush.msrb.mxu1 %v882_v56 }
 0x2c2   : > { %1407 = vmatmul.msk.f32.vlgmr.msrb.gmra.mxu1 %vm737_vm0, %v858_v54 }
 0x32b   : > { %v777_v60 = vpop.f32.mrf.mxu0 }
 0x331   : > { %v757_v61 = vpop.f32.mrf.mxu3 }
 0x334   : > { %v819_v0 = vpop.f32.mrf.mxu0 }
 0x335   : > { %v820_v63 = vadd.f32 %v819_v0, %v777_v60 }
 0x339   : > { %v799_v62 = vpop.f32.mrf.mxu3 }
 0x33a   : > { %v800_v41 = vadd.f32 %v799_v62, %v757_v61 }
 0x33f   : > { %v932_v4 = vpop.f32.mrf.mxu1 }
 0x340   : > { %v936_v6 = vadd.f32 %v932_v4, %v820_v63 }
 0x341   : > { %v912_v9 = vpop.f32.mrf.mxu3 }
 0x342   : > { %v944_v8 = vmul.f32 %v941_v5, %v936_v6  ;;  %v935_v10 = vadd.f32 %v912_v9, %v800_v41 }
 0x344   : > { %v952_v11 = vadd.f32 %v949_v7, %v944_v8  ;;  %v943_v12 = vmul.f32 %v941_v5, %v935_v10 }
 0x346   : > { %vm954_vm2 = vcmp.gt.f32.partialorder %v952_v11, 0.0  ;;  %v956_v13 = vmul.f32 0.01, %v952_v11  ;;  %v951_v14 = vadd.f32 %v949_v7, %v943_v12 }
 0x348   : > { %v958_v15 = vsel %vm954_vm2, %v952_v11, %v956_v13  ;;  %vm953_vm3 = vcmp.gt.f32.partialorder %v951_v14, 0.0  ;;  %v955_v16 = vmul.f32 0.01, %v951_v14 }
 0x349   : > { %963 = vrot.lane.b32.xlu1 %v958_v15, %s1808_s26 }
 0x34a   : > { %v957_v17 = vsel %vm953_vm3, %v951_v14, %v955_v16 }
 0x34b   : > { %961 = vrot.lane.b32.xlu0 %v957_v17, %s1808_s26 }
 0x3bb   : > { %v964_v18 = vpop.permute.xlu1 %963 }
 0x3bc   : > { %972 = vst.msk [vmem:[#allocation3 + $0x10] sm:$0xff] %vm478_vm4, %v964_v18 }
 0x3bd   : > { %v962_v24 = vpop.permute.xlu0 %961 }
 0x3be   : > { %v2169_v25 = vsel %vm478_vm4, %v962_v24, %v964_v18  ;;  %970 = vst.msk [vmem:[#allocation3] sm:$0xff] %vm969_vm5, %v962_v24 }
 0x3bf   : > { %v1012_v28 = vmul.f32 %v2169_v25, %v2020_v46  ;;  %v1146_v34 = vmul.f32 %v2169_v25, %v2119_v42  ;;  %v976_v16 = vmul.f32 %v2169_v25, %v2043_v58 }
 0x3c3   : > { %v2171_v26 = vld [vmem:[#allocation3 + $0x10] sm:$0xff] }
 0x3c4   : > { %v1013_v30 = vmul.f32 %v2171_v26, %v2014_v44  ;;  %v1150_v44 = vmul.f32 %v2171_v26, %v2041_v57  ;;  %v979_v57 = vmul.f32 %v2169_v25, %v2092_v23  ;;  %v1147_v13 = vmul.f32 %v2171_v26, %v2112_v35  ;;  %v1241_v35 = vld [vmem:[%s2304_s9] sm:$0xff] }
 0x3c5   : > { %v2173_v27 = vld [vmem:[#allocation3] sm:$0xff] }
 0x3c6   : > { %v1575_v29 = vpack.i.bf16 %v2169_v25, %v2173_v27  ;;  %v1148_v31 = vmul.f32 %v2173_v27, %v2024_v48  ;;  %v1011_v32 = vmul.f32 %v2173_v27, %v2016_v45  ;;  %v1145_v33 = vmul.f32 %v2173_v27, %v2114_v36 }
 0x3c7   : > { %v980_v45 = vmul.f32 %v2171_v26, %v2083_v20  ;;  %v1149_v48 = vmul.f32 %v2169_v25, %v2047_v59  ;;  %v978_v42 = vmul.f32 %v2173_v27, %v2088_v22  ;;  %v1008_v20 = vmul.f32 %v2173_v27, %v2063_v1 }
 0x3c8   : > { %1576 = vrot.lane.b32.xlu1 %v1575_v29, %s1813_s18  ;;  %v1580_v46 = vpack.i.bf16 %v1148_v31, %v1013_v30  ;;  %v1585_v37 = vpack.i.bf16 %v1012_v28, %v1011_v32  ;;  %v1615_v38 = vpack.i.bf16 %v1146_v34, %v1145_v33  ;;  %v1009_v59 = vmul.f32 %v2169_v25, %v2069_v3 }
 0x3c9   : > { %v1590_v36 = vpack.i.bf16 %v1150_v44, %v1149_v48  ;;  %v1600_v40 = vpack.i.bf16 %v979_v57, %v978_v42  ;;  %v1010_v22 = vmul.f32 %v2171_v26, %v2065_v2  ;;  %v975_v15 = vmul.f32 %v2173_v27, %v2003_v39  ;;  %v1249_v39 = vld [vmem:[%s2305_s10] sm:$0xff] }
 0x3ca   : > { %1581 = vrot.lane.b32.xlu0 %v1580_v46, %s1814_s20  ;;  %1586 = vrot.lane.b32.xlu2 %v1585_v37, %s1814_s20  ;;  %v1595_v49 = vpack.i.bf16 %v1009_v59, %v1008_v20 }
 0x3d0   : > { %1001 = vrot.lane.b32.xlu1 %v980_v45, %s1814_s20 }
 0x3d2   : > { %1591 = vrot.lane.b32.xlu0 %v1590_v36, %s1814_s20  ;;  %988 = vrot.lane.b32.xlu2 %v2171_v26, %s1813_s18 }
 0x3d8   : > { %1601 = vrot.lane.b32.xlu1 %v1600_v40, %s1814_s20  ;;  %s1750_s20 = scalar_lea.hbm %s2307_s12, 32 }
 0x3da   : > { %1596 = vrot.lane.b32.xlu0 %v1595_v49, %s1818_s19  ;;  %1026 = vrot.lane.b32.xlu2 %v1007_v43, %s1817_s17  ;;  %s1420_s17 = sshll.u32 %s1907_s25, 4  ;;  %s1266_s25 = scalar_lea.sflag [#allocation6], %s463_s29 }
 0x3e2   : > { %1035 = vrot.lane.b32.xlu2 %v1010_v22, %s1818_s19 }
 0x424   : > { %v1587_v23 = vpop.permute.xlu2 %1586 }
 0x425   : > { %v1589_v1 = vunpack.i.h.bf16 %v1587_v23  ;;  %v1588_v47 = vunpack.i.l.bf16 %v1587_v23 }
 0x427   : > { %v1023_v60 = vsel %vm659_vm11, %v1588_v47, %v1589_v1 }
 0x42c   : > { %v989_v3 = vpop.permute.xlu2 %988 }
 0x434   : > { %v1027_v17 = vpop.permute.xlu2 %1026 }
 0x43a   : > { %v1577_v51 = vpop.permute.xlu1 %1576 }
 0x43b   : > { %v1579_v52 = vunpack.i.h.bf16 %v1577_v51  ;;  %v1578_v50 = vunpack.i.l.bf16 %v1577_v51 }
 0x43c   : > { %v1582_v19 = vpop.permute.xlu0 %1581  ;;  %v1036_v58 = vpop.permute.xlu2 %1035 }
 0x43d   : > { %v1583_v21 = vunpack.i.l.bf16 %v1582_v19  ;;  %v990_v53 = vsel %vm645_vm12, %v1578_v50, %v1579_v52  ;;  %v991_v54 = vsel %vm645_vm12, %v1579_v52, %v989_v3  ;;  %v1584_v63 = vunpack.i.h.bf16 %v1582_v19 }
 0x43e   : > { %v1610_v55 = vpack.i.bf16 %v991_v54, %v990_v53 }
 0x43f   : > { %v1605_v56 = vpack.i.bf16 %v989_v3, %v1583_v21  ;;  %v1024_v2 = vsel %vm659_vm11, %v1589_v1, %v1583_v21 }
 0x440   : > { %1611 = vrot.lane.b32.xlu2 %v1610_v55, %s1818_s19  ;;  %v1625_v61 = vpack.i.bf16 %v1024_v2, %v1023_v60 }
 0x441   : > { %1606 = vrot.lane.b32.xlu0 %v1605_v56, %s1818_s19 }
 0x442   : > { %1626 = vrot.lane.b32.xlu1 %v1625_v61, %s1818_s19  ;;  %v1002_v62 = vpop.permute.xlu1 %1001 }
 0x444   : > { %v1592_v0 = vpop.permute.xlu0 %1591 }
 0x445   : > { %v1594_v4 = vunpack.i.h.bf16 %v1592_v0  ;;  %v1593_v5 = vunpack.i.l.bf16 %v1592_v0 }
 0x447   : > { %v1160_v6 = vsel %vm659_vm11, %v1584_v63, %v1593_v5  ;;  %v1161_v41 = vsel %vm659_vm11, %v1593_v5, %v1594_v4  ;;  %v1635_v14 = vpack.i.bf16 %v989_v3, %v1594_v4 }
 0x448   : > { %1616 = vrot.lane.b32.xlu2 %v1615_v38, %s1819_s28  ;;  %v1630_v7 = vpack.i.bf16 %v1161_v41, %v1160_v6 }
 0x449   : > { %1621 = vrot.lane.b32.xlu0 %v1610_v55, %s1819_s28 }
 0x44a   : > { %1631 = vrot.lane.b32.xlu1 %v1630_v7, %s1819_s28  ;;  %v1602_v8 = vpop.permute.xlu1 %1601 }
 0x44b   : > { %v1604_v9 = vunpack.i.h.bf16 %v1602_v8  ;;  %v1603_v10 = vunpack.i.l.bf16 %v1602_v8 }
 0x44c   : > { %v1597_v18 = vpop.permute.xlu0 %1596 }
 0x44d   : > { %v1003_v11 = vsel %vm659_vm11, %v1603_v10, %v1604_v9  ;;  %v1004_v12 = vsel %vm659_vm11, %v1604_v9, %v1002_v62  ;;  %v1599_v33 = vunpack.i.h.bf16 %v1597_v18  ;;  %v1598_v34 = vunpack.i.l.bf16 %v1597_v18 }
 0x44e   : > { %1118 = vmatpush.msrb.mxu3 %v1003_v11  ;;  %1138 = vmatpush.msra.mxu1 %v1004_v12 }
 0x44f   : > { %v1049_v48 = vsel %vm724_vm15, %v1598_v34, %v1599_v33  ;;  %v1050_v36 = vsel %vm724_vm15, %v1599_v33, %v1036_v58 }
 0x450   : > { %1171 = vrot.lane.b32.xlu2 %v1147_v13, %s1819_s28  ;;  %1119 = vmatpush.msrb.mxu3 %v990_v53 }
 0x451   : > { %1162 = vrot.lane.b32.xlu0 %v1007_v43, %s1820_s5  ;;  %1139 = vmatpush.msra.mxu1 %v991_v54  ;;  %s1277_s5 = scalar_lea.hbm %s2307_s12, %s1420_s17 }
 0x452   : > { %1636 = vrot.lane.b32.xlu1 %v1635_v14, %s1819_s28  ;;  %1120 = vmatpush.msrb.mxu3 %v975_v15  ;;  %s1281_s27 = sshll.u32 %s1277_s5, 4  ;;  %s1282_s27 = int_to_ptr.hbm [resolvable:$true] %s1281_s27 }
 0x453   : > { %1140 = vmatpush.msra.mxu1 %v976_v16  ;;  %1410 = vmatmul.msk.f32.vlgmr.msrb.gmra.mxu3 %vm737_vm0, %v1007_v43  ;;  %s1744_s30 = sshra.s32 %s1282_s27, 4  ;;  %s1745_s30 = int_to_ptr.hbm [resolvable:$true] %s1744_s30 }
 0x454   : > { %1411 = vmatmul.msk.f32.vlgmr.msra.gmra.mxu1 %vm737_vm0, %v1007_v43  ;;  %s1746_s26 = scalar_lea.hbm %s1745_s30, 16  ;;  %p1751_p3 = scmp.lt.s32.totalorder %s1745_s30, %s2307_s12 }
 0x455   : > { %p1747_p0 = scmp.ne.s32.totalorder %s1745_s30, %s1746_s26  ;;  %p1752_p4 = scmp.lt.s32.totalorder %s1750_s20, %s1746_s26 }
 0x457   : > { %p1748_p1 = pnand %p1747_p0, %p1924_p5  ;;  %p1753_p7 = por %p1752_p4, %p1751_p3 }
 0x459   : > { %1244 = vperm.xlu0 %1507, %v1241_v35   ;;  %p1749_p2 = pneg %p1748_p1 }
 0x45a   : > { %1252 = vperm.xlu1 %1573, %v1249_v39  }
 0x45b   : > { %p1754_p8 = pnand %p1753_p7, %p1749_p2 }
 0x49a   : > { %v1612_v24 = vpop.permute.xlu2 %1611 }
 0x49b   : > { %v1614_v26 = vunpack.i.h.bf16 %v1612_v24  ;;  %v1613_v29 = vunpack.i.l.bf16 %v1612_v24 }
 0x49d   : > { %v1051_v38 = vsel %vm724_vm15, %v1613_v29, %v1614_v26 }
 0x4a2   : > { %v1617_v42 = vpop.permute.xlu2 %1616 }
 0x4a3   : > { %v1619_v49 = vunpack.i.h.bf16 %v1617_v42  ;;  %v1618_v22 = vunpack.i.l.bf16 %v1617_v42 }
 0x4a5   : > { %v1185_v47 = vsel %vm880_vm1, %v1618_v22, %v1619_v49 }
 0x4aa   : > { %v1172_v21 = vpop.permute.xlu2 %1171 }
 0x4ab   : > { %v1186_v54 = vsel %vm880_vm1, %v1619_v49, %v1172_v21 }
 0x4b3   : > { %v1607_v25 = vpop.permute.xlu0 %1606 }
 0x4b4   : > { %v1608_v27 = vunpack.i.l.bf16 %v1607_v25  ;;  %v1627_v28 = vpop.permute.xlu1 %1626  ;;  %v1609_v30 = vunpack.i.h.bf16 %v1607_v25 }
 0x4b5   : > { %v1629_v31 = vunpack.i.h.bf16 %v1627_v28  ;;  %v1628_v32 = vunpack.i.l.bf16 %v1627_v28 }
 0x4b6   : > { %v1052_v44 = vsel %vm724_vm15, %v1614_v26, %v1609_v30 }
 0x4b7   : > { %v1053_v46 = vsel %vm724_vm15, %v1628_v32, %v1629_v31  ;;  %v1054_v37 = vsel %vm724_vm15, %v1629_v31, %v1608_v27 }
 0x4b8   : > { %1076 = vmatpush.msrb.mxu2 %v1053_v46  ;;  %1096 = vmatpush.msrb.mxu0 %v1054_v37 }
 0x4ba   : > { %1077 = vmatpush.msrb.mxu2 %v1051_v38  ;;  %1097 = vmatpush.msrb.mxu0 %v1052_v44 }
 0x4bb   : > { %v1622_v45 = vpop.permute.xlu0 %1621 }
 0x4bc   : > { %v1632_v57 = vpop.permute.xlu1 %1631  ;;  %1078 = vmatpush.msrb.mxu2 %v1049_v48  ;;  %1098 = vmatpush.msrb.mxu0 %v1050_v36  ;;  %v1624_v20 = vunpack.i.h.bf16 %v1622_v45  ;;  %v1623_v40 = vunpack.i.l.bf16 %v1622_v45 }
 0x4bd   : > { %v1634_v59 = vunpack.i.h.bf16 %v1632_v57  ;;  %v1633_v43 = vunpack.i.l.bf16 %v1632_v57  ;;  %1408 = vmatmul.msk.f32.vlgmr.msrb.gmra.mxu2 %vm737_vm0, %v1027_v17  ;;  %1409 = vmatmul.msk.f32.vlgmr.msrb.gmra.mxu0 %vm737_vm0, %v1027_v17 }
 0x4be   : > { %v1187_v51 = vsel %vm880_vm1, %v1623_v40, %v1624_v20 }
 0x4bf   : > { %v1189_v23 = vsel %vm880_vm1, %v1633_v43, %v1634_v59 }
 0x4c0   : > { %1212 = vmatpush.msra.mxu2 %v1189_v23 }
 0x4c2   : > { %1213 = vmatpush.msra.mxu2 %v1187_v51 }
 0x4c3   : > { %v1163_v1 = vpop.permute.xlu0 %1162 }
 0x4c4   : > { %v1637_v52 = vpop.permute.xlu1 %1636  ;;  %1214 = vmatpush.msra.mxu2 %v1185_v47 }
 0x4c5   : > { %v1639_v50 = vunpack.i.h.bf16 %v1637_v52  ;;  %v1638_v3 = vunpack.i.l.bf16 %v1637_v52  ;;  %1412 = vmatmul.msk.f32.vlgmr.msra.gmra.mxu2 %vm737_vm0, %v1163_v1 }
 0x4c7   : > { %v1190_v19 = vsel %vm880_vm1, %v1634_v59, %v1638_v3  ;;  %v1188_v53 = vsel %vm880_vm1, %v1624_v20, %v1639_v50 }
 0x4c8   : > { %1232 = vmatpush.msra.mxu0 %v1190_v19 }
 0x4ca   : > { %1233 = vmatpush.msra.mxu0 %v1188_v53 }
 0x4cb   : > { %v1245_v4 = vpop.permute.xlu0 %1244 }
 0x4cc   : > { %1234 = vmatpush.msra.mxu0 %v1186_v54  ;;  %v1253_v7 = vpop.permute.xlu1 %1252 }
 0x4cd   : > { %1413 = vmatmul.msk.f32.vlgmr.msra.gmra.mxu0 %vm737_vm0, %v1163_v1 }
 0x4d1   : > { %v1142_v2 = vpop.f32.mrf.mxu1 }
 0x4d6   : > { %v1122_v60 = vpop.f32.mrf.mxu3 }
 0x53a   : > { %v1100_v56 = vpop.f32.mrf.mxu0 }
 0x53b   : > { %v1143_v0 = vadd.f32 %v1142_v2, %v1100_v56 }
 0x540   : > { %v1080_v55 = vpop.f32.mrf.mxu2 }
 0x541   : > { %v1123_v61 = vadd.f32 %v1122_v60, %v1080_v55 }
 0x548   : > { %v1216_v62 = vpop.f32.mrf.mxu2 }
 0x549   : > { %v1239_v63 = vadd.f32 %v1216_v62, %v1123_v61 }
 0x54a   : > { %v1236_v5 = vpop.f32.mrf.mxu0 }
 0x54b   : > { %v1247_v6 = vmul.f32 %v1245_v4, %v1239_v63  ;;  %v1240_v41 = vadd.f32 %v1236_v5, %v1143_v0 }
 0x54d   : > { %v1255_v8 = vadd.f32 %v1253_v7, %v1247_v6  ;;  %v1248_v9 = vmul.f32 %v1245_v4, %v1240_v41 }
 0x54f   : > { %vm1257_vm4 = vcmp.gt.f32.partialorder %v1255_v8, 0.0  ;;  %v1259_v10 = vmul.f32 0.01, %v1255_v8  ;;  %v1256_v11 = vadd.f32 %v1253_v7, %v1248_v9 }
 0x551   : > { %v1261_v12 = vsel %vm1257_vm4, %v1255_v8, %v1259_v10  ;;  %vm1258_vm6 = vcmp.gt.f32.partialorder %v1256_v11, 0.0  ;;  %v1260_v13 = vmul.f32 0.01, %v1256_v11 }
 0x552   : > { %1263 = vst [vmem:[%s465_s4] sm:$0xff] %v1261_v12 }
 0x553   : > { %v1262_v14 = vsel %vm1258_vm6, %v1256_v11, %v1260_v13 }
 0x554   : > { %1264 = vst [vmem:[%s465_s4 + $0x8] sm:$0xff] %v1262_v14 }
 0x555   : > { %1757 = shalt.err (!%p1754_p8)
}
 0x556   : > { %1433 = dma.vmem_to_hbm [thread:$0]  (%p1924_p5), %s1280_s23, 256, %s1282_s27, %s1266_s25  }
 0x557 PF: > { %p1455_p9 = scmp.ge.s32.totalorder %s1800_s24, 2  ;;  %s1293_s29 = sand.u32 1, %s1788_s21  }
 0x558   : > { %s1294_s19 = scalar_lea.sflag [#allocation6], %s1293_s29 }
 0x559   : > { %p1446_p10 = pnand %p1455_p9, %p1928_p6 }
 0x55b   : > { %p1447_p11 = pneg %p1446_p10 }
 0x55d   : > { %1783 = dma.done.wait (%p1447_p11), %s1294_s19, 256  }
 0x55e   : > { %1785 = vsyncadd (%p1447_p11), %s1294_s19, 4294967040  ;;  %s2322_s24 = sld [smem:[#allocation15_spill]]  ;;  %s2325_s21 = smov %s1792_s22 }
 0x55f   : > { %s2323_s28 = sld [smem:[#allocation14_spill]] }
 0x560   : > { %s2324_s23 = sld [smem:[#allocation16_spill]] }
 0x564   : > { %p24_p12 = scmp.ge.s32.totalorder %s2322_s24, 4  }
 0x565   : > { %s2326_s22 = smov %s2323_s28 }
 0x566   :  { %26 = sbr.rel (!%p24_p12) target bundleno = 8 (0x8), region = 120 }
 0x56b   :  { %1300 = vsyncpa [#allocation5], 1 }
 0x56c   :  { %1302 = vsyncpa [#allocation5 + $0x1], 1 }
 0x56d   :  { %1303 = vsyncpa [#allocation8], 1 }
 0x56e   :  { %1304 = vsyncpa [#allocation6], 1 }
 0x56f   :  { %1306 = vsyncpa [#allocation6 + $0x1], 1 }

</bundles_post_ra>
